<compile_context>
chip_gen: v6e
topology: v6e:2x2x1
jax: 0.10.0
libtpu: 0.0.40
codegen_flags: <defaults>
</compile_context>

<pallas_src>
import functools

import jax
import jax.numpy as jnp
from jax import lax
from jax.experimental import pallas as pl
from jax.experimental.pallas import tpu as pltpu


def _router_kernel(x_ref, w1t_ref, b1_ref, b2_ref, w2t_ref,
                   rw_ref, idx_ref, tkw_ref, usage_ref,
                   *, inv_temp, total_tokens, padded_tokens):
    E, tb = rw_ref.shape

    # ----- router MLP, transposed (experts/hidden on sublanes, tokens on lanes) -----
    # h^T = W1^T @ x^T  : contract the hidden-in axis of both operands (A @ B^T form)
    hT = lax.dot_general(
        w1t_ref[...], x_ref[...],
        dimension_numbers=(((1,), (1,)), ((), ())),
        preferred_element_type=jnp.float32)                     # (H, tb) f32
    hT = jnp.maximum(hT + b1_ref[...], 0.0)

    # logits^T = W2^T @ h^T
    logits = jnp.dot(w2t_ref[...], hT.astype(jnp.bfloat16),
                     preferred_element_type=jnp.float32)        # (E, tb) f32
    if inv_temp != 1.0:
        logits = logits * inv_temp
    logits = logits + b2_ref[...]          # b2/temp (+ expert mask) pre-folded

    # ----- softmax over experts (sublane axis) -----
    m = jnp.max(logits, axis=0, keepdims=True)                  # (1, tb)
    e = jnp.exp(logits - m)                                     # (E, tb)
    denom = jnp.sum(e, axis=0, keepdims=True)                   # (1, tb)
    inv_denom = pl.reciprocal(denom, approx=False)
    p = e * inv_denom
    rw_ref[...] = p.astype(rw_ref.dtype)                        # lane-dense store

    # ----- top-2, reusing softmax stats -----
    # top-1 prob is exp(0)/denom == 1/denom; top-1 index from logits == m
    ids = lax.broadcasted_iota(jnp.int32, (E, tb), 0)
    idx1 = jnp.min(jnp.where(logits == m, ids, E), axis=0, keepdims=True)
    max1 = inv_denom
    p2 = jnp.where(ids == idx1, -1.0, p)     # probs >= 0, so -1 masks safely
    max2 = jnp.max(p2, axis=0, keepdims=True)
    idx2 = jnp.min(jnp.where(p2 == max2, ids, E), axis=0, keepdims=True)

    inv_s = pl.reciprocal(max1 + max2, approx=False)
    tkw_ref[0:1, :] = (max1 * inv_s).astype(tkw_ref.dtype)
    tkw_ref[1:2, :] = (max2 * inv_s).astype(tkw_ref.dtype)
    idx_ref[0:1, :] = idx1
    idx_ref[1:2, :] = idx2

    # ----- per-tile partial sum of p over tokens (no cross-iteration carry) -----
    if padded_tokens != total_tokens:       # static: only when the wrapper padded T
        tok = pl.program_id(0) * tb + lax.broadcasted_iota(jnp.int32, (1, tb), 1)
        p = jnp.where(tok < total_tokens, p, 0.0)
    usage_ref[...] = jnp.sum(p, axis=1, keepdims=True)[None, :, :]   # (1, E, 1)


def _round_up(a, b):
    return (a + b - 1) // b * b


def load_balancing_router(x, w1, b1, w2, b2, expert_mask=None, *,
                          temperature=1.0, balance_weight=0.01, block_tokens=512):
    """Returns (routing_weights, expert_indices, top_k_weights, load_balance_loss)."""
    B, S, H = x.shape
    E = w2.shape[1]
    T = B * S
    inv_temp = float(1.0 / temperature)

    # token tile: multiple of 128 (lane width), clamped near T for tiny inputs
    tb = max(128, _round_up(min(int(block_tokens), T), 128))
    t_pad = _round_up(T, tb)
    num_tiles = t_pad // tb

    xt = x.reshape(T, H).astype(jnp.bfloat16)
    if t_pad != T:
        xt = jnp.pad(xt, ((0, t_pad - T), (0, 0)))

    w1t = jnp.asarray(w1, jnp.bfloat16).T              # (H_out, H_in)
    w2t = jnp.asarray(w2, jnp.bfloat16).T              # (E, H)
    b1c = jnp.asarray(b1, jnp.float32).reshape(H, 1)
    bias2 = jnp.asarray(b2, jnp.float32) * inv_temp    # fold temperature
    if expert_mask is not None:
        bias2 = bias2 + jnp.asarray(expert_mask, jnp.float32)   # fold mask
    b2c = bias2.reshape(E, 1)

    kernel = functools.partial(_router_kernel, inv_temp=inv_temp,
                               total_tokens=T, padded_tokens=t_pad)

    grid_spec = pltpu.PrefetchScalarGridSpec(
        num_scalar_prefetch=0,
        grid=(num_tiles,),
        in_specs=[
            pl.BlockSpec((tb, H), lambda i: (i, 0)),       # x tile (bf16)
            pl.BlockSpec((H, H), lambda i: (0, 0)),        # W1^T (resident, bf16)
            pl.BlockSpec((H, 1), lambda i: (0, 0)),        # b1 column (f32)
            pl.BlockSpec((E, 1), lambda i: (0, 0)),        # folded bias2 column (f32)
            pl.BlockSpec((E, H), lambda i: (0, 0)),        # W2^T (resident, bf16)
        ],
        out_specs=[
            pl.BlockSpec((E, tb), lambda i: (0, i)),       # routing_weights^T
            pl.BlockSpec((2, tb), lambda i: (0, i)),       # expert_indices^T
            pl.BlockSpec((2, tb), lambda i: (0, i)),       # top_k_weights^T
            pl.BlockSpec((1, E, 1), lambda i: (i, 0, 0)),  # per-tile usage partials
        ],
    )

    rwT, idxT, tkwT, usage = pl.pallas_call(
        kernel,
        grid_spec=grid_spec,
        out_shape=(
            jax.ShapeDtypeStruct((E, t_pad), jnp.float32),
            jax.ShapeDtypeStruct((2, t_pad), jnp.int32),
            jax.ShapeDtypeStruct((2, t_pad), jnp.float32),
            jax.ShapeDtypeStruct((num_tiles, E, 1), jnp.float32),
        ),
        compiler_params=pltpu.CompilerParams(
            dimension_semantics=("parallel",),     # no carried state -> both TCs on v7x
            vmem_limit_bytes=32 * 1024 * 1024),
    )(xt, w1t, b1c, b2c, w2t)

    # layout plumbing back to the torch convention (token-major)
    routing_weights = rwT[:, :T].T.reshape(B, S, E)
    expert_indices = idxT[:, :T].T.reshape(B, S, 2)
    top_k_weights = tkwT[:, :T].T.reshape(B, S, 2)

    # expert_usage == routing_weights.mean over all tokens (padded tokens excluded in-kernel)
    expert_usage = jnp.sum(usage[:, :, 0], axis=0) / T
    # torch.std defaults to unbiased (ddof=1)
    load_balance_loss = balance_weight * (jnp.std(expert_usage, ddof=1) /
                                          jnp.mean(expert_usage))
    return routing_weights, expert_indices, top_k_weights, load_balance_loss


def _init_linear(key, fan_in, fan_out):
    # deterministic init mimicking nn.Linear: U(-1/sqrt(fan_in), 1/sqrt(fan_in))
    kw, kb = jax.random.split(key)
    bound = 1.0 / (fan_in ** 0.5)
    w = jax.random.uniform(kw, (fan_in, fan_out), jnp.float32, -bound, bound)
    b = jax.random.uniform(kb, (fan_out,), jnp.float32, -bound, bound)
    return w, b


if __name__ == "__main__":
    B, S, H, E = 2, 8, 32, 8
    TOP_K = 2
    TEMPERATURE = 1.0
    BALANCE_WEIGHT = 0.01

    key = jax.random.PRNGKey(0)
    kx, k1, k2 = jax.random.split(key, 3)
    x = jax.random.normal(kx, (B, S, H), jnp.float32)
    w1, b1 = _init_linear(k1, H, H)
    w2, b2 = _init_linear(k2, H, E)

    rw, idx, tkw, loss = load_balancing_router(
        x, w1, b1, w2, b2, expert_mask=None,
        temperature=TEMPERATURE, balance_weight=BALANCE_WEIGHT)
    jax.block_until_ready((rw, idx, tkw, loss))

    # ----- pure-JAX reference (same bf16-operand / f32-accumulate matmul path) -----
    T = B * S
    xt = x.reshape(T, H)
    h_ref = jnp.maximum(
        jnp.dot(xt.astype(jnp.bfloat16), w1.astype(jnp.bfloat16),
                preferred_element_type=jnp.float32) + b1, 0.0)
    logits_ref = (jnp.dot(h_ref.astype(jnp.bfloat16), w2.astype(jnp.bfloat16),
                          preferred_element_type=jnp.float32) + b2) / TEMPERATURE
    rw_ref = jax.nn.softmax(logits_ref, axis=-1)
    tk_raw, _ = lax.top_k(rw_ref, TOP_K)
    tk_ref = tk_raw / tk_raw.sum(-1, keepdims=True)
    usage_ref = rw_ref.mean(0)
    loss_ref = BALANCE_WEIGHT * (jnp.std(usage_ref, ddof=1) / jnp.mean(usage_ref))

    rw2 = rw.reshape(T, E)
    idx2 = idx.reshape(T, TOP_K)
    tkw2 = tkw.reshape(T, TOP_K)

    assert jnp.allclose(rw2, rw_ref, rtol=1e-3, atol=1e-5), "routing_weights mismatch"
    # tie-robust index check: the probabilities gathered at the kernel's indices must
    # match the reference top-k probabilities, and the two indices must be distinct.
    gathered = jnp.take_along_axis(rw2, idx2, axis=-1)
    assert jnp.allclose(gathered, tk_raw, rtol=1e-3, atol=1e-5), "expert_indices mismatch"
    assert bool(jnp.all(idx2[:, 0] != idx2[:, 1])), "duplicate expert indices"
    assert jnp.allclose(tkw2, tk_ref, rtol=1e-3, atol=1e-5), "top_k_weights mismatch"
    assert jnp.allclose(loss, loss_ref, rtol=2e-3, atol=1e-6), "load_balance_loss mismatch"

    print("KERNEL_OK")
</pallas_src>

<mosaic_0001>
module attributes {stable_mosaic.version = 11 : i64} {
  func.func @_router_kernel(%arg0: i32, %arg1: memref<128x32xbf16, #tpu.memory_space<vmem>>, %arg2: memref<32x32xbf16, #tpu.memory_space<vmem>>, %arg3: memref<32x1xf32, #tpu.memory_space<vmem>>, %arg4: memref<8x1xf32, #tpu.memory_space<vmem>>, %arg5: memref<8x32xbf16, #tpu.memory_space<vmem>>, %arg6: memref<8x128xf32, #tpu.memory_space<vmem>>, %arg7: memref<2x128xi32, #tpu.memory_space<vmem>>, %arg8: memref<2x128xf32, #tpu.memory_space<vmem>>, %arg9: memref<1x8x1xf32, #tpu.memory_space<vmem>>) attributes {dimension_semantics = [#tpu.dimension_semantics<parallel>], iteration_bounds = array<i64: 1>, scalar_prefetch = 0 : i64, scratch_operands = 0 : i64, tpu.core_type = #tpu.core_type<tc>, window_params = [{transform_indices = @transform_0, window_bounds = array<i64: 128, 32>}, {pipeline_mode = #tpu.pipeline_mode<synchronous>, transform_indices = @transform_1, window_bounds = array<i64: 32, 32>}, {pipeline_mode = #tpu.pipeline_mode<synchronous>, transform_indices = @transform_2, window_bounds = array<i64: 32, 1>}, {pipeline_mode = #tpu.pipeline_mode<synchronous>, transform_indices = @transform_3, window_bounds = array<i64: 8, 1>}, {pipeline_mode = #tpu.pipeline_mode<synchronous>, transform_indices = @transform_4, window_bounds = array<i64: 8, 32>}, {transform_indices = @transform_5, window_bounds = array<i64: 8, 128>}, {transform_indices = @transform_6, window_bounds = array<i64: 2, 128>}, {transform_indices = @transform_7, window_bounds = array<i64: 2, 128>}, {transform_indices = @transform_8, window_bounds = array<i64: 1, 8, 1>}]} {
    %c0 = arith.constant 0 : index
    %c0_0 = arith.constant 0 : index
    %0 = vector.load %arg2[%c0, %c0_0] : memref<32x32xbf16, #tpu.memory_space<vmem>>, vector<32x32xbf16>
    %c0_1 = arith.constant 0 : index
    %c0_2 = arith.constant 0 : index
    %1 = vector.load %arg1[%c0_1, %c0_2] : memref<128x32xbf16, #tpu.memory_space<vmem>>, vector<128x32xbf16>
    %cst = arith.constant dense<0.000000e+00> : vector<32x128xf32>
    %2 = tpu.matmul %0, %1, %cst {dimension_numbers = #tpu.dot_dimension_numbers<[1], [1], [0], [0], [0, 0, 1, 0], [], []>} : vector<32x32xbf16>, vector<128x32xbf16>, vector<32x128xf32> -> vector<32x128xf32>
    %c0_3 = arith.constant 0 : index
    %c0_4 = arith.constant 0 : index
    %3 = vector.load %arg3[%c0_3, %c0_4] : memref<32x1xf32, #tpu.memory_space<vmem>>, vector<32x1xf32>
    %4 = vector.broadcast %3 : vector<32x1xf32> to vector<32x128xf32>
    %5 = arith.addf %2, %4 : vector<32x128xf32>
    %cst_5 = arith.constant 0.000000e+00 : f32
    %6 = vector.broadcast %cst_5 : f32 to vector<32x128xf32>
    %7 = arith.maximumf %5, %6 : vector<32x128xf32>
    %c0_6 = arith.constant 0 : index
    %c0_7 = arith.constant 0 : index
    %8 = vector.load %arg5[%c0_6, %c0_7] : memref<8x32xbf16, #tpu.memory_space<vmem>>, vector<8x32xbf16>
    %9 = arith.truncf %7 : vector<32x128xf32> to vector<32x128xbf16>
    %cst_8 = arith.constant dense<0.000000e+00> : vector<8x128xf32>
    %10 = tpu.matmul %8, %9, %cst_8 {dimension_numbers = #tpu.dot_dimension_numbers<[1], [0], [0], [1], [0, 0, 1, 1], [], []>} : vector<8x32xbf16>, vector<32x128xbf16>, vector<8x128xf32> -> vector<8x128xf32>
    %c0_9 = arith.constant 0 : index
    %c0_10 = arith.constant 0 : index
    %11 = vector.load %arg4[%c0_9, %c0_10] : memref<8x1xf32, #tpu.memory_space<vmem>>, vector<8x1xf32>
    %12 = vector.broadcast %11 : vector<8x1xf32> to vector<8x128xf32>
    %13 = arith.addf %10, %12 : vector<8x128xf32>
    %cst_11 = arith.constant dense<0xFF800000> : vector<128xf32>
    %14 = vector.multi_reduction <maximumf>, %13, %cst_11 [0] : vector<8x128xf32> to vector<128xf32>
    %15 = vector.shape_cast %14 : vector<128xf32> to vector<1x128xf32>
    %16 = vector.broadcast %15 : vector<1x128xf32> to vector<8x128xf32>
    %17 = arith.subf %13, %16 : vector<8x128xf32>
    %18 = math.exp %17 : vector<8x128xf32>
    %cst_12 = arith.constant dense<0.000000e+00> : vector<128xf32>
    %19 = vector.multi_reduction <add>, %18, %cst_12 [0] : vector<8x128xf32> to vector<128xf32>
    %20 = vector.shape_cast %19 : vector<128xf32> to vector<1x128xf32>
    %21 = tpu.reciprocal %20 : vector<1x128xf32> -> vector<1x128xf32>
    %22 = vector.broadcast %21 : vector<1x128xf32> to vector<8x128xf32>
    %23 = arith.mulf %18, %22 : vector<8x128xf32>
    %c0_13 = arith.constant 0 : index
    %c0_14 = arith.constant 0 : index
    %24 = vector.load %arg6[%c0_13, %c0_14] : memref<8x128xf32, #tpu.memory_space<vmem>>, vector<8x128xf32>
    tpu.vector_store %arg6[%c0_13, %c0_14], %23 {strides = array<i32>} : memref<8x128xf32, #tpu.memory_space<vmem>>, vector<8x128xf32>,
    %25 = tpu.iota {dimensions = array<i32: 0>} : vector<8x128xi32>
    %26 = vector.broadcast %15 : vector<1x128xf32> to vector<8x128xf32>
    %27 = arith.cmpf oeq, %13, %26 : vector<8x128xf32>
    %c8_i32 = arith.constant 8 : i32
    %28 = vector.broadcast %c8_i32 : i32 to vector<8x128xi32>
    %29 = arith.select %27, %25, %28 : vector<8x128xi1>, vector<8x128xi32>
    %cst_15 = arith.constant dense<2147483647> : vector<128xi32>
    %30 = vector.multi_reduction <minsi>, %29, %cst_15 [0] : vector<8x128xi32> to vector<128xi32>
    %31 = vector.shape_cast %30 : vector<128xi32> to vector<1x128xi32>
    %32 = vector.broadcast %31 : vector<1x128xi32> to vector<8x128xi32>
    %33 = arith.cmpi eq, %25, %32 : vector<8x128xi32>
    %cst_16 = arith.constant -1.000000e+00 : f32
    %34 = vector.broadcast %cst_16 : f32 to vector<8x128xf32>
    %35 = arith.select %33, %34, %23 : vector<8x128xi1>, vector<8x128xf32>
    %cst_17 = arith.constant dense<0xFF800000> : vector<128xf32>
    %36 = vector.multi_reduction <maximumf>, %35, %cst_17 [0] : vector<8x128xf32> to vector<128xf32>
    %37 = vector.shape_cast %36 : vector<128xf32> to vector<1x128xf32>
    %38 = vector.broadcast %37 : vector<1x128xf32> to vector<8x128xf32>
    %39 = arith.cmpf oeq, %35, %38 : vector<8x128xf32>
    %c8_i32_18 = arith.constant 8 : i32
    %40 = vector.broadcast %c8_i32_18 : i32 to vector<8x128xi32>
    %41 = arith.select %39, %25, %40 : vector<8x128xi1>, vector<8x128xi32>
    %cst_19 = arith.constant dense<2147483647> : vector<128xi32>
    %42 = vector.multi_reduction <minsi>, %41, %cst_19 [0] : vector<8x128xi32> to vector<128xi32>
    %43 = vector.shape_cast %42 : vector<128xi32> to vector<1x128xi32>
    %44 = arith.addf %21, %37 : vector<1x128xf32>
    %45 = tpu.reciprocal %44 : vector<1x128xf32> -> vector<1x128xf32>
    %46 = arith.mulf %21, %45 : vector<1x128xf32>
    %c0_20 = arith.constant 0 : index
    %c0_21 = arith.constant 0 : index
    %47 = vector.load %arg8[%c0_20, %c0_21] : memref<2x128xf32, #tpu.memory_space<vmem>>, vector<1x128xf32>
    tpu.vector_store %arg8[%c0_20, %c0_21], %46 {strides = array<i32>} : memref<2x128xf32, #tpu.memory_space<vmem>>, vector<1x128xf32>,
    %48 = arith.mulf %37, %45 : vector<1x128xf32>
    %c1 = arith.constant 1 : index
    %c0_22 = arith.constant 0 : index
    %49 = vector.load %arg8[%c1, %c0_22] : memref<2x128xf32, #tpu.memory_space<vmem>>, vector<1x128xf32>
    tpu.vector_store %arg8[%c1, %c0_22], %48 {strides = array<i32>} : memref<2x128xf32, #tpu.memory_space<vmem>>, vector<1x128xf32>,
    %c0_23 = arith.constant 0 : index
    %c0_24 = arith.constant 0 : index
    %50 = vector.load %arg7[%c0_23, %c0_24] : memref<2x128xi32, #tpu.memory_space<vmem>>, vector<1x128xi32>
    tpu.vector_store %arg7[%c0_23, %c0_24], %31 {strides = array<i32>} : memref<2x128xi32, #tpu.memory_space<vmem>>, vector<1x128xi32>,
    %c1_25 = arith.constant 1 : index
    %c0_26 = arith.constant 0 : index
    %51 = vector.load %arg7[%c1_25, %c0_26] : memref<2x128xi32, #tpu.memory_space<vmem>>, vector<1x128xi32>
    tpu.vector_store %arg7[%c1_25, %c0_26], %43 {strides = array<i32>} : memref<2x128xi32, #tpu.memory_space<vmem>>, vector<1x128xi32>,
    %c128_i32 = arith.constant 128 : i32
    %52 = arith.muli %arg0, %c128_i32 : i32
    %53 = tpu.iota {dimensions = array<i32: 1>} : vector<1x128xi32>
    %54 = vector.broadcast %52 : i32 to vector<1x128xi32>
    %55 = arith.addi %54, %53 : vector<1x128xi32>
    %c16_i32 = arith.constant 16 : i32
    %56 = vector.broadcast %c16_i32 : i32 to vector<1x128xi32>
    %57 = arith.cmpi slt, %55, %56 : vector<1x128xi32>
    %cst_27 = arith.constant 0.000000e+00 : f32
    %58 = vector.shape_cast %57 : vector<1x128xi1> to vector<1x128xi1>
    %59 = vector.broadcast %58 : vector<1x128xi1> to vector<8x128xi1>
    %60 = vector.broadcast %cst_27 : f32 to vector<8x128xf32>
    %61 = arith.select %59, %23, %60 : vector<8x128xi1>, vector<8x128xf32>
    %cst_28 = arith.constant dense<0.000000e+00> : vector<8xf32>
    %62 = vector.multi_reduction <add>, %61, %cst_28 [1] : vector<8x128xf32> to vector<8xf32>
    %63 = vector.shape_cast %62 : vector<8xf32> to vector<8x1xf32>
    %64 = vector.shape_cast %63 : vector<8x1xf32> to vector<1x8x1xf32>
    %c0_29 = arith.constant 0 : index
    %c0_30 = arith.constant 0 : index
    %c0_31 = arith.constant 0 : index
    %65 = vector.load %arg9[%c0_29, %c0_30, %c0_31] : memref<1x8x1xf32, #tpu.memory_space<vmem>>, vector<1x8x1xf32>
    tpu.vector_store %arg9[%c0_29, %c0_30, %c0_31], %64 {strides = array<i32>} : memref<1x8x1xf32, #tpu.memory_space<vmem>>, vector<1x8x1xf32>,
    return
  }
  func.func @transform_0(%arg0: i32) -> (i32, i32) {
    %c0_i32 = arith.constant 0 : i32
    %c0_i32_0 = arith.constant 0 : i32
    return %arg0, %c0_i32 : i32, i32
  }
  func.func @transform_1(%arg0: i32) -> (i32, i32) {
    %c0_i32 = arith.constant 0 : i32
    %c0_i32_0 = arith.constant 0 : i32
    %c0_i32_1 = arith.constant 0 : i32
    return %c0_i32, %c0_i32_0 : i32, i32
  }
  func.func @transform_2(%arg0: i32) -> (i32, i32) {
    %c0_i32 = arith.constant 0 : i32
    %c0_i32_0 = arith.constant 0 : i32
    %c0_i32_1 = arith.constant 0 : i32
    return %c0_i32, %c0_i32_0 : i32, i32
  }
  func.func @transform_3(%arg0: i32) -> (i32, i32) {
    %c0_i32 = arith.constant 0 : i32
    %c0_i32_0 = arith.constant 0 : i32
    %c0_i32_1 = arith.constant 0 : i32
    return %c0_i32, %c0_i32_0 : i32, i32
  }
  func.func @transform_4(%arg0: i32) -> (i32, i32) {
    %c0_i32 = arith.constant 0 : i32
    %c0_i32_0 = arith.constant 0 : i32
    %c0_i32_1 = arith.constant 0 : i32
    return %c0_i32, %c0_i32_0 : i32, i32
  }
  func.func @transform_5(%arg0: i32) -> (i32, i32) {
    %c0_i32 = arith.constant 0 : i32
    %c0_i32_0 = arith.constant 0 : i32
    return %c0_i32, %arg0 : i32, i32
  }
  func.func @transform_6(%arg0: i32) -> (i32, i32) {
    %c0_i32 = arith.constant 0 : i32
    %c0_i32_0 = arith.constant 0 : i32
    return %c0_i32, %arg0 : i32, i32
  }
  func.func @transform_7(%arg0: i32) -> (i32, i32) {
    %c0_i32 = arith.constant 0 : i32
    %c0_i32_0 = arith.constant 0 : i32
    return %c0_i32, %arg0 : i32, i32
  }
  func.func @transform_8(%arg0: i32) -> (i32, i32, i32) {
    %c0_i32 = arith.constant 0 : i32
    %c0_i32_0 = arith.constant 0 : i32
    %c0_i32_1 = arith.constant 0 : i32
    return %arg0, %c0_i32, %c0_i32_0 : i32, i32, i32
  }
}

</mosaic_0001>

<bundles_post_ra>
// kernel: tpu_custom_call.1
= control target key start
LH: loop header
LB: loop body
LE: loop exit
PB: predicated region body
PF: predicated region fallthrough
CT: control target
= control target key end

     0   :  { %14 = vsyncpa [#allocation3], 0  ;;  %vm121_vm0 = vcmask 261120   ;;  %v523_v3 = vmov 0   ;;  %s653_s0 = inlined_call_operand.vmem [shape: bf16[128,32], index: 0, kind: input, shape index: {}]   ;;  %s654_s1 = inlined_call_operand.vmem [shape: bf16[32,32], index: 1, kind: input, shape index: {}]   ;;  %s655_s2 = inlined_call_operand.vmem [shape: f32[32,1], index: 2, kind: input, shape index: {}]   ;;  %s656_s3 = inlined_call_operand.vmem [shape: f32[8,1], index: 3, kind: input, shape index: {}]   ;;  %s657_s4 = inlined_call_operand.vmem [shape: bf16[8,32], index: 4, kind: input, shape index: {}]   ;;  %s658_s5 = inlined_call_operand.hbm [shape: f32[8,128], index: 5, kind: output, shape index: {0}]   ;;  %s659_s6 = inlined_call_operand.hbm [shape: s32[2,128], index: 6, kind: output, shape index: {1}]   ;;  %s660_s7 = inlined_call_operand.hbm [shape: f32[2,128], index: 7, kind: output, shape index: {2}]   ;;  %s661_s8 = inlined_call_operand.vmem [shape: f32[1,8,1], index: 8, kind: output, shape index: {3}]  }
   0x1   :  { %v443_v0 = vld [vmem:[%s653_s0 + $0x38] sm:$0xff]   ;;  %v444_v1 = vld [vmem:[%s653_s0 + $0x30] sm:$0xff]   ;;  %441 = vset.pattern.permute.xlu0 %v523_v3  ;;  %442 = vset.pattern.permute.xlu1 %v523_v3  ;;  %v445_v4 = vld [vmem:[%s653_s0 + $0x28] sm:$0xff]  }
   0x2   :  { %427 = vmatprep.subr.msk.bf16.mxu0 %vm121_vm0, %v443_v0  ;;  %v150_v2 = vsel %vm121_vm0, %v443_v0, 0  ;;  %v147_v5 = vsel %vm121_vm0, %v444_v1, 0  ;;  %v451_v6 = vld [vmem:[%s654_s1] sm:$0xff]   ;;  %v49_v7 = vld [vmem:[%s655_s2 + $0x10] sm:$0xff] }
   0x3   :  { %400 = vmatpush3.bf16.xpose.msra.mxu0 %v150_v2  ;;  %415 = vmatprep.mubr.msk.bf16.mxu0 %vm121_vm0, %v451_v6  ;;  %v47_v8 = vld [vmem:[%s655_s2] sm:$0xff] }
   0x4   :  { %428 = vmatprep.subr.msk.bf16.mxu0 %vm121_vm0, %v444_v1  ;;  %63 = vperm.xlu0 %441, %v49_v7  }
   0xb   :  { %402 = vmatpush3.bf16.xpose.msra.mxu0 %v147_v5 }
   0xc   :  { %15 = vsyncpa [#allocation5], 0  ;;  %429 = vmatprep.subr.msk.bf16.mxu0 %vm121_vm0, %v445_v4  ;;  %v50_v9 = vld [vmem:[%s655_s2 + $0x18] sm:$0xff]  ;;  %53 = vperm.xlu1 %442, %v47_v8   ;;  %v48_v10 = vld [vmem:[%s655_s2 + $0x8] sm:$0xff]  ;;  %v144_v11 = vsel %vm121_vm0, %v445_v4, 0  ;;  %v524_v24 = vmov 0.0   ;;  %v275_v53 = vlaneseq }
   0xd   :  { %68 = vperm.xlu0 %441, %v50_v9   ;;  %v446_v12 = vld [vmem:[%s653_s0 + $0x20] sm:$0xff]   ;;  %v447_v15 = vld [vmem:[%s653_s0 + $0x18] sm:$0xff]   ;;  %v448_v17 = vld [vmem:[%s653_s0 + $0x10] sm:$0xff]   ;;  %419 = vmatprep.subr.bf16.mxu1 %v524_v24  ;;  %vm525_vm1 = vmmov 0  }
   0xe   :  { %v208_v13 = vld [vmem:[%s656_s3] sm:$0xff]  ;;  %v141_v14 = vsel %vm121_vm0, %v446_v12, 0  ;;  %v138_v16 = vsel %vm121_vm0, %v447_v15, 0  ;;  %v135_v18 = vsel %vm121_vm0, %v448_v17, 0  ;;  %v449_v19 = vld [vmem:[%s653_s0 + $0x8] sm:$0xff]   ;;  %423 = vmatprep.mubr.msk.bf16.mxu1 %vm525_vm1, %v524_v24  ;;  %v276_v56 = vshrl.u32 %v275_v53, 7 }
   0xf   :  { %v132_v20 = vsel %vm121_vm0, %v449_v19, 0  ;;  %v450_v21 = vld [vmem:[%s653_s0] sm:$0xff]   ;;  %v452_v23 = vld [vmem:[%s654_s1 + $0x8] sm:$0xff]  }
  0x10   :  { %58 = vperm.xlu1 %442, %v48_v10   ;;  %v129_v22 = vsel %vm121_vm0, %v450_v21, 0  ;;  %v205_v43 = vld [vmem:[%s657_s4] sm:$0xf]  ;;  %v317_v10 = vand.u32 127, %v275_v53  ;;  %s526_s4 = smov [#allocation2]  }
  0x11   :  { %211 = vperm.xlu0 %441, %v208_v13   ;;  %s334_s11 = sshll.u32 %s526_s4, 4  ;;  %s335_s11 = int_to_ptr.vmem [resolvable:$true] %s334_s11 }
  0x12   :  { %vm320_vm6 = vcmp.lt.s32.totalorder %v317_v10, 16  ;;  %s459_s12 = scalar_lea.vmem %s335_s11, 128  ;;  %p464_p1 = scmp.lt.s32.totalorder %s335_s11, %s335_s11 }
  0x13   :  { %404 = vmatpush3.bf16.xpose.msra.mxu0 %v144_v11  ;;  %p460_p0 = scmp.ne.s32.totalorder %s335_s11, %s459_s12  ;;  %p465_p2 = scmp.lt.s32.totalorder %s459_s12, %s459_s12 }
  0x14   :  { %430 = vmatprep.subr.msk.bf16.mxu0 %vm121_vm0, %v446_v12 }
  0x15   :  { %p466_p3 = por %p465_p2, %p464_p1 }
  0x17   :  { %p467_p4 = pnand %p466_p3, %p460_p0 }
  0x1b   :  { %406 = vmatpush3.bf16.xpose.msra.mxu0 %v141_v14 }
  0x1c   :  { %431 = vmatprep.subr.msk.bf16.mxu0 %vm121_vm0, %v447_v15 }
  0x23   :  { %408 = vmatpush3.bf16.xpose.msra.mxu0 %v138_v16 }
  0x24   :  { %432 = vmatprep.subr.msk.bf16.mxu0 %vm121_vm0, %v448_v17 }
  0x2b   :  { %410 = vmatpush3.bf16.xpose.msra.mxu0 %v135_v18 }
  0x2c   :  { %433 = vmatprep.subr.msk.bf16.mxu0 %vm121_vm0, %v449_v19 }
  0x33   :  { %412 = vmatpush3.bf16.xpose.msra.mxu0 %v132_v20 }
  0x34   :  { %434 = vmatprep.subr.msk.bf16.mxu0 %vm121_vm0, %v450_v21 }
  0x3b   :  { %414 = vmatpush3.bf16.xpose.msra.mxu0 %v129_v22 }
  0x42   :  { %416 = vmatmul.mubr.msk.bf16.vlgmr.msra.gmra.mxu0 %vm121_vm0, %v452_v23 }
  0x7f   :  { %v64_v25 = vpop.permute.xlu0 %63 }
  0x87   :  { %v54_v26 = vpop.permute.xlu1 %53 }
  0x88   :  { %v69_v30 = vpop.permute.xlu0 %68 }
  0x8b   :  { %v59_v33 = vpop.permute.xlu1 %58 }
  0x8c   :  { %v212_v44 = vpop.permute.xlu0 %211 }
 0x102   :  { %v417_v27 = vpop.f32.mrf.mxu0 }
 0x103   :  { %v195_v29 = vadd.f32 %v417_v27, %v64_v25 }
 0x104   :  { %v186_v28 = vpop.f32.mrf.mxu0 }
 0x105   :  { %v203_v35 = vmax.f32 %v195_v29, 0.0  ;;  %v187_v36 = vadd.f32 %v186_v28, %v54_v26 }
 0x106   :  { %v418_v31 = vpop.f32.mrf.mxu0 }
 0x107   :  { %v198_v32 = vadd.f32 %v418_v31, %v69_v30  ;;  %v201_v41 = vmax.f32 %v187_v36, 0.0 }
 0x108   :  { %v189_v34 = vpop.f32.mrf.mxu0 }
 0x109   :  { %v204_v37 = vmax.f32 %v198_v32, 0.0  ;;  %v190_v38 = vadd.f32 %v189_v34, %v59_v33 }
 0x10b   :  { %v202_v39 = vmax.f32 %v190_v38, 0.0  ;;  %v207_v40 = vpack.c.bf16 %v204_v37, %v203_v35 }
 0x10d   :  { %420 = vmatpush3.bf16.msra.mxu1 %v207_v40  ;;  %v206_v42 = vpack.c.bf16 %v202_v39, %v201_v41 }
 0x10e   :  { %421 = vmatprep.subr.bf16.mxu1 %v524_v24 }
 0x111   :  { %422 = vmatpush3.bf16.msra.mxu1 %v206_v42 }
 0x114   :  { %424 = vmatmul.mubr.msk.bf16.vlgmr.msra.gmra.mxu1 %vm121_vm0, %v205_v43 }
 0x1d4   :  { %v251_v45 = vpop.f32.mrf.mxu1 }
 0x1d5   :  { %v252_v46 = vadd.f32 %v251_v45, %v212_v44 }
 0x1d6   :  { %v425_v47 = vpop.f32.mrf.mxu1 }
 0x1d7   :  { %v257_v48 = vrot.slane %v252_v46, 4 }
 0x1d8   :  { %v254_v49 = vpop.f32.mrf.mxu1 }
 0x1d9   :  { %v258_v50 = vmax.f32 %v252_v46, %v257_v48 }
 0x1da   :  { %v426_v51 = vpop.f32.mrf.mxu1 }
 0x1db   :  { %v259_v52 = vrot.slane %v258_v50, 2 }
 0x1dd   :  { %v260_v54 = vmax.f32 %v258_v50, %v259_v52 }
 0x1df   :  { %v261_v55 = vrot.slane %v260_v54, 1 }
 0x1e1   :  { %v262_v57 = vmax.f32 %v260_v54, %v261_v55 }
 0x1e3   :  { %v263_v58 = vsub.f32 %v252_v46, %v262_v57  ;;  %vm277_vm2 = vcmp.eq.f32.partialorder %v252_v46, %v262_v57 }
 0x1e4   :  { %v278_v59 = vsel %vm277_vm2, %v276_v56, 8 }
 0x1e5   :  { %v264_v60 = vmul.f32 1.442695, %v263_v58  ;;  %v279_v61 = vrot.slane %v278_v59, 4 }
 0x1e7   :  { %453 = vpow2.f32 %v264_v60  ;;  %vm280_vm3 = vcmp.lt.s32.totalorder %v278_v59, %v279_v61 }
 0x1e8   :  { %v281_v62 = vsel %vm280_vm3, %v278_v59, %v279_v61 }
 0x1e9   :  { %v282_v63 = vrot.slane %v281_v62, 2 }
 0x1eb   :  { %vm283_vm4 = vcmp.lt.s32.totalorder %v281_v62, %v282_v63 }
 0x1ec   :  { %v284_v0 = vsel %vm283_vm4, %v281_v62, %v282_v63 }
 0x1ed   :  { %v285_v1 = vrot.slane %v284_v0, 1 }
 0x1ef   :  { %vm286_vm5 = vcmp.lt.s32.totalorder %v284_v0, %v285_v1 }
 0x1f0   :  { %v287_v2 = vsel %vm286_vm5, %v284_v0, %v285_v1 }
 0x1f1   :  { %313 = vst [vmem:[#allocation4] sm:$0x1] %v287_v2  ;;  %vm288_vm7 = vcmp.eq.s32.totalorder %v276_v56, %v287_v2 }
 0x1f4   :  { %v454_v3 = vpop.eup %453 }
 0x1f5   :  { %v266_v4 = vrot.slane %v454_v3, 4 }
 0x1f7   :  { %v267_v5 = vadd.f32 %v454_v3, %v266_v4 }
 0x1f9   :  { %v268_v6 = vrot.slane %v267_v5, 2 }
 0x1fb   :  { %v269_v7 = vadd.f32 %v268_v6, %v267_v5 }
 0x1fd   :  { %v270_v8 = vrot.slane %v269_v7, 1 }
 0x1ff   :  { %v271_v9 = vadd.f32 %v270_v8, %v269_v7 }
 0x201   :  { %455 = vrcp.f32 %v271_v9 }
 0x20e   :  { %v456_v11 = vpop.eup %455 }
 0x20f   :  { %v273_v12 = vmul.f32 %v456_v11, %v454_v3 }
 0x211   :  { %v323_v13 = vsel %vm320_vm6, %v273_v12, 0.0  ;;  %274 = vst [vmem:[#allocation2] sm:$0xff] %v273_v12  ;;  %v289_v14 = vsel %vm288_vm7, -1.0, %v273_v12 }
 0x212   :  { %324 = vadd.xlane.f32.xlu1 %v323_v13  ;;  %v290_v15 = vrot.slane %v289_v14, 4 }
 0x214   :  { %v291_v16 = vmax.f32 %v289_v14, %v290_v15 }
 0x216   :  { %v292_v17 = vrot.slane %v291_v16, 2 }
 0x218   :  { %v293_v18 = vmax.f32 %v291_v16, %v292_v17 }
 0x21a   :  { %v294_v19 = vrot.slane %v293_v18, 1 }
 0x21c   :  { %v295_v20 = vmax.f32 %v293_v18, %v294_v19 }
 0x21d   :  { %470 = shalt.err (!%p467_p4)
}
 0x21e   :  { %337 = dma.vmem_to_hbm [thread:$0]  %s335_s11, 128, %s658_s5, [#allocation3]   ;;  %vm296_vm8 = vcmp.eq.f32.partialorder %v289_v14, %v295_v20  ;;  %v307_v21 = vadd.f32 %v456_v11, %v295_v20 }
 0x21f   :  { %v297_v22 = vsel %vm296_vm8, %v276_v56, 8  ;;  %s527_s15 = smov [#allocation4]   ;;  %s528_s17 = smov [#allocation6]  }
 0x220   :  { %v298_v23 = vrot.slane %v297_v22, 4  ;;  %457 = vrcp.f32 %v307_v21  ;;  %s344_s16 = sshll.u32 %s527_s15, 4  ;;  %s354_s18 = sshll.u32 %s528_s17, 4  ;;  %s345_s16 = int_to_ptr.vmem [resolvable:$true] %s344_s16  ;;  %s355_s18 = int_to_ptr.vmem [resolvable:$true] %s354_s18 }
 0x221   :  { %s479_s5 = scalar_lea.vmem %s345_s16, 32  ;;  %p484_p6 = scmp.lt.s32.totalorder %s345_s16, %s345_s16 }
 0x222   :  { %vm299_vm9 = vcmp.lt.s32.totalorder %v297_v22, %v298_v23  ;;  %p480_p5 = scmp.ne.s32.totalorder %s345_s16, %s479_s5  ;;  %p485_p7 = scmp.lt.s32.totalorder %s479_s5, %s479_s5 }
 0x223   :  { %v300_v24 = vsel %vm299_vm9, %v297_v22, %v298_v23 }
 0x224   :  { %v301_v25 = vrot.slane %v300_v24, 2  ;;  %p486_p8 = por %p485_p7, %p484_p6 }
 0x226   :  { %vm302_vm10 = vcmp.lt.s32.totalorder %v300_v24, %v301_v25  ;;  %p487_p9 = pnand %p486_p8, %p480_p5 }
 0x227   :  { %v303_v26 = vsel %vm302_vm10, %v300_v24, %v301_v25 }
 0x228   :  { %v304_v27 = vrot.slane %v303_v26, 1 }
 0x22a   :  { %vm305_vm11 = vcmp.lt.s32.totalorder %v303_v26, %v304_v27 }
 0x22b   :  { %v306_v28 = vsel %vm305_vm11, %v303_v26, %v304_v27 }
 0x22c   :  { %314 = vst [vmem:[#allocation4 + $0x1] sm:$0x1] %v306_v28 }
 0x22d   :  { %v458_v29 = vpop.eup %457 }
 0x22e   :  { %490 = shalt.err (!%p487_p9)
}
 0x22f   :  { %347 = dma.vmem_to_hbm [thread:$0]  %s345_s16, 32, %s659_s6, [#allocation5]   ;;  %v309_v30 = vmul.f32 %v458_v29, %v456_v11  ;;  %v311_v31 = vmul.f32 %v458_v29, %v295_v20 }
 0x230   :  { %s499_s21 = scalar_lea.vmem %s355_s18, 32  ;;  %p504_p11 = scmp.lt.s32.totalorder %s355_s18, %s355_s18 }
 0x231   :  { %310 = vst [vmem:[#allocation6] sm:$0x1] %v309_v30  ;;  %312 = vst [vmem:[#allocation6 + $0x1] sm:$0x1] %v311_v31  ;;  %p500_p10 = scmp.ne.s32.totalorder %s355_s18, %s499_s21  ;;  %p505_p12 = scmp.lt.s32.totalorder %s499_s21, %s499_s21 }
 0x233   :  { %p506_p13 = por %p505_p12, %p504_p11 }
 0x235   :  { %p507_p0 = pnand %p506_p13, %p500_p10 }
 0x237   :  { %510 = shalt.err (!%p507_p0)
}
 0x238   :  { %357 = dma.vmem_to_hbm [thread:$0]  %s355_s18, 32, %s660_s7, [#allocation5]   ;;  %vm326_vm12 = vcmask 7168  }
 0x29b   :  { %v325_v32 = vpop.xlane.xlu1 %324 }
 0x29c   :  { %327 = vst.msk [vmem:[%s661_s8] sm:$0xff] %vm326_vm12, %v325_v32 }
 0x29d   :  { %519 = dma.done.wait [#allocation3], 128  }
 0x29e   :  { %520 = vsyncadd [#allocation3], 4294967168 }
 0x29f   :  { %521 = dma.done.wait [#allocation5], 64  }
 0x2a0   :  { %522 = vsyncadd [#allocation5], 4294967232 }
 0x2a1   :  { %371 = vsyncpa [#allocation3], 1 }
 0x2a2   :  { %372 = vsyncpa [#allocation5], 1 }

</bundles_post_ra>
